<compile_context>
chip_gen: v5e
topology: v5e:2x2
jax: 0.10.0
libtpu: 0.0.40
codegen_flags: <defaults>
</compile_context>

<pallas_src>
import functools

import jax
import jax.numpy as jnp
from jax.experimental import pallas as pl
from jax.experimental.pallas import tpu as pltpu


def _round_up(v, m):
    return (v + m - 1) // m * m


# ----------------------------- Pallas kernel --------------------------------

def fused_gcn_kernel(a_ref, x0_ref, w_ref, b_ref, o_ref, x_scr):
    """Grid axis 0 = layer index.

    Per step:  out_l = [relu]( A_hat @ (X_l @ W_l) + b_l )
    X_l lives in VMEM scratch across layers; A_hat stays VMEM-resident
    (its index_map returns the same block for every grid step).
    """
    l = pl.program_id(0)
    last = pl.num_programs(0) - 1

    @pl.when(l == 0)
    def _():
        x_scr[...] = x0_ref[...]

    # X @ W on the MXU (bf16 inputs, f32 accumulate), then A @ (XW) + b.
    xw = jnp.dot(x_scr[...], w_ref[0], preferred_element_type=jnp.float32)
    out = jnp.dot(a_ref[...], xw.astype(jnp.bfloat16),
                  preferred_element_type=jnp.float32) + b_ref[0]

    @pl.when(l != last)
    def _():
        x_scr[...] = jnp.maximum(out, 0.0).astype(x_scr.dtype)

    @pl.when(l == last)
    def _():
        o_ref[...] = out.astype(o_ref.dtype)


def fused_gcn_forward(a_norm, x, weights, biases):
    """All GCN layers in one pallas_call. weights[i]: [f_in, f_out], biases[i]: [1, f_out]."""
    num_layers = len(weights)
    n, f_in0 = x.shape
    dims = [f_in0] + [w.shape[1] for w in weights]

    fp = _round_up(max(dims), 128)    # lane-aligned common feature width
    np_ = _round_up(n, 128)           # lane/sublane-aligned node count

    # Zero-pad + cast to bf16 (zero pad rows/cols never influence real rows:
    # padded A columns are zero, so padded-node activations never mix back in).
    a_pad = jnp.zeros((np_, np_), jnp.bfloat16).at[:n, :n].set(
        a_norm.astype(jnp.bfloat16))
    x_pad = jnp.zeros((np_, fp), jnp.bfloat16).at[:n, :f_in0].set(
        x.astype(jnp.bfloat16))
    w_stack = jnp.stack([
        jnp.zeros((fp, fp), jnp.bfloat16).at[:w.shape[0], :w.shape[1]].set(
            w.astype(jnp.bfloat16))
        for w in weights])                                   # [L, fp, fp]
    b_stack = jnp.stack([
        jnp.zeros((1, fp), jnp.float32).at[:, :b.shape[1]].set(
            b.astype(jnp.float32))
        for b in biases])                                    # [L, 1, fp]

    out_pad = pl.pallas_call(
        fused_gcn_kernel,
        out_shape=jax.ShapeDtypeStruct((np_, fp), jnp.float32),
        grid=(num_layers,),
        in_specs=[
            pl.BlockSpec((np_, np_), lambda l: (0, 0)),      # A_hat: VMEM-resident
            pl.BlockSpec((np_, fp), lambda l: (0, 0)),       # X0
            pl.BlockSpec((1, fp, fp), lambda l: (l, 0, 0)),  # W_l (pipelined per layer)
            pl.BlockSpec((1, 1, fp), lambda l: (l, 0, 0)),   # b_l
        ],
        out_specs=pl.BlockSpec((np_, fp), lambda l: (0, 0)), # written only at last layer
        scratch_shapes=[pltpu.VMEM((np_, fp), jnp.bfloat16)],
        compiler_params=pltpu.CompilerParams(
            dimension_semantics=("arbitrary",)),             # layers are sequential
    )(a_pad, x_pad, w_stack, b_stack)

    return out_pad[:n, :weights[-1].shape[1]]


# ------------------------------ JAX glue -------------------------------------

def build_normalized_adjacency(edge_index, num_nodes):
    """Dense A_hat = D^{-1/2} (A + I) D^{-1/2}, PyG GCNConv convention.

    edge_index: int32 [2, E], row 0 = source nodes, row 1 = target nodes.
    """
    src, dst = edge_index[0], edge_index[1]
    loops = jnp.arange(num_nodes, dtype=edge_index.dtype)
    src = jnp.concatenate([src, loops])
    dst = jnp.concatenate([dst, loops])
    deg = jnp.zeros((num_nodes,), jnp.float32).at[dst].add(1.0)
    dinv = jnp.where(deg > 0, 1.0 / jnp.sqrt(deg), 0.0)
    norm = dinv[src] * dinv[dst]
    a = jnp.zeros((num_nodes, num_nodes), jnp.float32).at[dst, src].add(norm)
    return a


def init_params(key, input_dim, hidden_dim, output_dim, num_layers):
    dims = [input_dim] + [hidden_dim] * (num_layers - 1) + [output_dim]
    params = []
    for i in range(num_layers):
        key, kw = jax.random.split(key)
        f_in, f_out = dims[i], dims[i + 1]
        scale = jnp.sqrt(6.0 / (f_in + f_out))
        w = jax.random.uniform(kw, (f_in, f_out), jnp.float32, -scale, scale)
        b = jnp.zeros((1, f_out), jnp.float32)
        params.append((w, b))
    return params


@jax.jit
def basic_network_forward(x, edge_index, params):
    """Forward of BasicNetwork(conv_block='GCN', need_postmp=False), eval mode."""
    a_norm = build_normalized_adjacency(edge_index, x.shape[0])
    weights = [w for (w, _) in params]
    biases = [b for (_, b) in params]
    # F.dropout(..., training=False) -> identity (both pre-layer and inter-layer).
    return fused_gcn_forward(a_norm, x, weights, biases)


def reference_forward(x, edge_index, params):
    """Pure-JAX f32 reference with identical semantics (for a loose sanity check)."""
    a = build_normalized_adjacency(edge_index, x.shape[0])
    num_layers = len(params)
    for i, (w, b) in enumerate(params):
        x = a @ (x @ w) + b
        if i != num_layers - 1:
            x = jnp.maximum(x, 0.0)
    return x


# ------------------------------- main ----------------------------------------

if __name__ == "__main__":
    key = jax.random.PRNGKey(0)

    num_nodes = 16
    input_dim = 8
    hidden_dim = 32
    output_dim = 8
    num_layers = 3
    num_edges = 40

    k_x, k_e, k_p = jax.random.split(key, 3)
    x = jax.random.normal(k_x, (num_nodes, input_dim), jnp.float32)
    edge_index = jax.random.randint(k_e, (2, num_edges), 0, num_nodes, jnp.int32)

    params = init_params(k_p, input_dim, hidden_dim, output_dim, num_layers)

    out = basic_network_forward(x, edge_index, params)
    out = jax.block_until_ready(out)

    assert out.shape == (num_nodes, output_dim)
    assert bool(jnp.all(jnp.isfinite(out)))

    ref = reference_forward(x, edge_index, params)
    # bf16 inputs with f32 accumulation -> loose tolerance.
    assert bool(jnp.allclose(out, ref, rtol=1e-1, atol=1e-1)), (
        "mismatch vs f32 reference")

    print("KERNEL_OK")
</pallas_src>

<mosaic_0001>
module attributes {stable_mosaic.version = 11 : i64} {
  func.func @fused_gcn_kernel(%arg0: i32, %arg1: memref<128x128xbf16, #tpu.memory_space<vmem>>, %arg2: memref<128x128xbf16, #tpu.memory_space<vmem>>, %arg3: memref<1x128x128xbf16, #tpu.memory_space<vmem>>, %arg4: memref<1x1x128xf32, #tpu.memory_space<vmem>>, %arg5: memref<128x128xf32, #tpu.memory_space<vmem>>, %arg6: memref<128x128xbf16, #tpu.memory_space<vmem>>) attributes {dimension_semantics = [#tpu.dimension_semantics<arbitrary>], iteration_bounds = array<i64: 3>, scalar_prefetch = 0 : i64, scratch_operands = 1 : i64, tpu.core_type = #tpu.core_type<tc>, window_params = [{pipeline_mode = #tpu.pipeline_mode<synchronous>, transform_indices = @transform_0, window_bounds = array<i64: 128, 128>}, {pipeline_mode = #tpu.pipeline_mode<synchronous>, transform_indices = @transform_1, window_bounds = array<i64: 128, 128>}, {transform_indices = @transform_2, window_bounds = array<i64: 1, 128, 128>}, {transform_indices = @transform_3, window_bounds = array<i64: 1, 1, 128>}, {pipeline_mode = #tpu.pipeline_mode<synchronous>, transform_indices = @transform_4, window_bounds = array<i64: 128, 128>}]} {
    %c0_i32 = arith.constant 0 : i32
    %0 = arith.cmpi eq, %arg0, %c0_i32 : i32
    %1 = arith.extui %0 : i1 to i32
    %c0_i32_0 = arith.constant 0 : i32
    %2 = arith.cmpi ne, %1, %c0_i32_0 : i32
    scf.if %2 {
      %c0_14 = arith.constant 0 : index
      %c0_15 = arith.constant 0 : index
      %20 = vector.load %arg2[%c0_14, %c0_15] : memref<128x128xbf16, #tpu.memory_space<vmem>>, vector<128x128xbf16>
      %c0_16 = arith.constant 0 : index
      %c0_17 = arith.constant 0 : index
      %21 = vector.load %arg6[%c0_16, %c0_17] : memref<128x128xbf16, #tpu.memory_space<vmem>>, vector<128x128xbf16>
      tpu.vector_store %arg6[%c0_16, %c0_17], %20 {strides = array<i32>} : memref<128x128xbf16, #tpu.memory_space<vmem>>, vector<128x128xbf16>,
    } else {
    }
    %c0 = arith.constant 0 : index
    %c0_1 = arith.constant 0 : index
    %3 = vector.load %arg6[%c0, %c0_1] : memref<128x128xbf16, #tpu.memory_space<vmem>>, vector<128x128xbf16>
    %c0_2 = arith.constant 0 : index
    %c0_3 = arith.constant 0 : index
    %c0_4 = arith.constant 0 : index
    %4 = vector.load %arg3[%c0_2, %c0_3, %c0_4] : memref<1x128x128xbf16, #tpu.memory_space<vmem>>, vector<1x128x128xbf16>
    %5 = vector.shape_cast %4 : vector<1x128x128xbf16> to vector<128x128xbf16>
    %cst = arith.constant dense<0.000000e+00> : vector<128x128xf32>
    %6 = tpu.matmul %3, %5, %cst {dimension_numbers = #tpu.dot_dimension_numbers<[1], [0], [0], [1], [0, 0, 1, 1], [], []>} : vector<128x128xbf16>, vector<128x128xbf16>, vector<128x128xf32> -> vector<128x128xf32>
    %c0_5 = arith.constant 0 : index
    %c0_6 = arith.constant 0 : index
    %7 = vector.load %arg1[%c0_5, %c0_6] : memref<128x128xbf16, #tpu.memory_space<vmem>>, vector<128x128xbf16>
    %8 = arith.truncf %6 : vector<128x128xf32> to vector<128x128xbf16>
    %cst_7 = arith.constant dense<0.000000e+00> : vector<128x128xf32>
    %9 = tpu.matmul %7, %8, %cst_7 {dimension_numbers = #tpu.dot_dimension_numbers<[1], [0], [0], [1], [0, 0, 1, 1], [], []>} : vector<128x128xbf16>, vector<128x128xbf16>, vector<128x128xf32> -> vector<128x128xf32>
    %c0_8 = arith.constant 0 : index
    %c0_9 = arith.constant 0 : index
    %c0_10 = arith.constant 0 : index
    %10 = vector.load %arg4[%c0_8, %c0_9, %c0_10] : memref<1x1x128xf32, #tpu.memory_space<vmem>>, vector<1x1x128xf32>
    %11 = vector.shape_cast %10 : vector<1x1x128xf32> to vector<1x128xf32>
    %12 = vector.broadcast %11 : vector<1x128xf32> to vector<128x128xf32>
    %13 = arith.addf %9, %12 : vector<128x128xf32>
    %c2_i32 = arith.constant 2 : i32
    %14 = arith.cmpi ne, %arg0, %c2_i32 : i32
    %15 = arith.extui %14 : i1 to i32
    %c0_i32_11 = arith.constant 0 : i32
    %16 = arith.cmpi ne, %15, %c0_i32_11 : i32
    scf.if %16 {
      %cst_14 = arith.constant 0.000000e+00 : f32
      %20 = vector.broadcast %cst_14 : f32 to vector<128x128xf32>
      %21 = arith.maximumf %13, %20 : vector<128x128xf32>
      %22 = arith.truncf %21 : vector<128x128xf32> to vector<128x128xbf16>
      %c0_15 = arith.constant 0 : index
      %c0_16 = arith.constant 0 : index
      %23 = vector.load %arg6[%c0_15, %c0_16] : memref<128x128xbf16, #tpu.memory_space<vmem>>, vector<128x128xbf16>
      tpu.vector_store %arg6[%c0_15, %c0_16], %22 {strides = array<i32>} : memref<128x128xbf16, #tpu.memory_space<vmem>>, vector<128x128xbf16>,
    } else {
    }
    %c2_i32_12 = arith.constant 2 : i32
    %17 = arith.cmpi eq, %arg0, %c2_i32_12 : i32
    %18 = arith.extui %17 : i1 to i32
    %c0_i32_13 = arith.constant 0 : i32
    %19 = arith.cmpi ne, %18, %c0_i32_13 : i32
    scf.if %19 {
      %c0_14 = arith.constant 0 : index
      %c0_15 = arith.constant 0 : index
      %20 = vector.load %arg5[%c0_14, %c0_15] : memref<128x128xf32, #tpu.memory_space<vmem>>, vector<128x128xf32>
      tpu.vector_store %arg5[%c0_14, %c0_15], %13 {strides = array<i32>} : memref<128x128xf32, #tpu.memory_space<vmem>>, vector<128x128xf32>,
    } else {
    }
    return
  }
  func.func @transform_0(%arg0: i32) -> (i32, i32) {
    %c0_i32 = arith.constant 0 : i32
    %c0_i32_0 = arith.constant 0 : i32
    %c0_i32_1 = arith.constant 0 : i32
    return %c0_i32, %c0_i32_0 : i32, i32
  }
  func.func @transform_1(%arg0: i32) -> (i32, i32) {
    %c0_i32 = arith.constant 0 : i32
    %c0_i32_0 = arith.constant 0 : i32
    %c0_i32_1 = arith.constant 0 : i32
    return %c0_i32, %c0_i32_0 : i32, i32
  }
  func.func @transform_2(%arg0: i32) -> (i32, i32, i32) {
    %c0_i32 = arith.constant 0 : i32
    %c0_i32_0 = arith.constant 0 : i32
    %c0_i32_1 = arith.constant 0 : i32
    return %arg0, %c0_i32, %c0_i32_0 : i32, i32, i32
  }
  func.func @transform_3(%arg0: i32) -> (i32, i32, i32) {
    %c0_i32 = arith.constant 0 : i32
    %c0_i32_0 = arith.constant 0 : i32
    %c0_i32_1 = arith.constant 0 : i32
    return %arg0, %c0_i32, %c0_i32_0 : i32, i32, i32
  }
  func.func @transform_4(%arg0: i32) -> (i32, i32) {
    %c0_i32 = arith.constant 0 : i32
    %c0_i32_0 = arith.constant 0 : i32
    %c0_i32_1 = arith.constant 0 : i32
    return %c0_i32, %c0_i32_0 : i32, i32
  }
}

</mosaic_0001>

<bundles_post_ra>
// kernel: mul.1
= control target key start
LH: loop header
LB: loop body
LE: loop exit
PB: predicated region body
PF: predicated region fallthrough
CT: control target
= control target key end

     0   :  { %s34_s0 = inlined_call_operand.vmem [shape: f32[56], index: 0, kind: input, shape index: {}]   ;;  %s35_s1 = inlined_call_operand.vmem [shape: f32[56], index: 1, kind: input, shape index: {}]   ;;  %s36_s2 = inlined_call_operand.vmem [shape: f32[56], index: 2, kind: output, shape index: {}]  }
   0x1   :  { %v3_v0 = vld [vmem:[%s34_s0] sm:$0x1] }
   0x2   :  { %v4_v1 = vld [vmem:[%s35_s1] sm:$0x1] }
   0x3   :  { %v7_v2 = vmul.f32 %v4_v1, %v3_v0 }
   0x5   :  { %9 = vst [vmem:[%s36_s2] sm:$0x1] %v7_v2 }

// kernel: basic_network_forward.1
= control target key start
LH: loop header
LB: loop body
LE: loop exit
PB: predicated region body
PF: predicated region fallthrough
CT: control target
= control target key end

     0   :  { %s881_s15 = smov 0   ;;  %s1044_s0 = inlined_call_operand.vmem [shape: bf16[128,128], index: 0, kind: input, shape index: {}]   ;;  %s1045_s1 = inlined_call_operand.vmem [shape: bf16[128,128], index: 1, kind: input, shape index: {}]   ;;  %s1046_s2 = inlined_call_operand.vmem [shape: bf16[3,128,128], index: 2, kind: input, shape index: {}]   ;;  %s1047_s3 = inlined_call_operand.vmem [shape: f32[3,1,128], index: 3, kind: input, shape index: {}]   ;;  %s1048_s4 = inlined_call_operand.vmem [shape: f32[128,128], index: 4, kind: output, shape index: {}]  }
   0x1 LB: > { %s887_s16 = sadd.s32 4294967295, %s854_s15   ;;  %p647_p0 = scmp.ge.s32.totalorder %s854_s15, 1  ;;  %s854_s15 = sphi %s881_s15, %s14_s15  }
   0x2   : > { %p165_p1 = scmp.lt.s32.totalorder %s854_s15, 4 }
   0x4   : > { %p166_p2 = pnand %p647_p0, %p165_p1 }
   0x5   : > { %p189_p3 = scmp.lt.s32.totalorder (!%p166_p2), %s887_s16, 2  ;;  %p650_p4 = scmp.ne.s32.totalorder (!%p166_p2), %s887_s16, 0 }
   0x6   : > { %169 = sbr.rel (%p166_p2) target bundleno = 503 (0x1f7), region = 36 }
   0xb   : > { %s893_s17 = scalar_select %p189_p3, %s887_s16, 2 }
   0xc   : > { %200 = sbr.rel (%p650_p4) target bundleno = 26 (0x1a), region = 40 }
   0xd   : > { %s751_s18 = sshll.u32 %s893_s17, 6  ;;  %s196_s21 = scalar_lea.vmem %s1047_s3, %s893_s17 }
   0xe   : > { %s903_s24 = scalar_lea.vmem %s1046_s2, %s751_s18 }
  0x11   : > { %v201_v0 = vld [vmem:[%s1045_s1] sm:$0xff]   ;;  %v203_v1 = vld [vmem:[%s1045_s1 + $0x8] sm:$0xff]   ;;  %v205_v2 = vld [vmem:[%s1045_s1 + $0x10] sm:$0xff]  }
  0x12   : > { %217 = vst [vmem:[#allocation2] sm:$0xff] %v201_v0   ;;  %v207_v3 = vld [vmem:[%s1045_s1 + $0x18] sm:$0xff]   ;;  %v209_v4 = vld [vmem:[%s1045_s1 + $0x20] sm:$0xff]   ;;  %v211_v5 = vld [vmem:[%s1045_s1 + $0x28] sm:$0xff]  }
  0x13   : > { %219 = vst [vmem:[#allocation2 + $0x8] sm:$0xff] %v203_v1   ;;  %v213_v6 = vld [vmem:[%s1045_s1 + $0x30] sm:$0xff]   ;;  %v215_v7 = vld [vmem:[%s1045_s1 + $0x38] sm:$0xff]  }
  0x14   : > { %221 = vst [vmem:[#allocation2 + $0x10] sm:$0xff] %v205_v2  }
  0x15   : > { %223 = vst [vmem:[#allocation2 + $0x18] sm:$0xff] %v207_v3  }
  0x16   : > { %225 = vst [vmem:[#allocation2 + $0x20] sm:$0xff] %v209_v4  }
  0x17   : > { %227 = vst [vmem:[#allocation2 + $0x28] sm:$0xff] %v211_v5  }
  0x18   : > { %229 = vst [vmem:[#allocation2 + $0x30] sm:$0xff] %v213_v6  }
  0x19   : > { %231 = vst [vmem:[#allocation2 + $0x38] sm:$0xff] %v215_v7  }
  0x1a PF: > { %v767_v8 = vld [vmem:[%s903_s24 + $0x38] sm:$0xff]  ;;  %v766_v9 = vld [vmem:[%s903_s24 + $0x30] sm:$0xff]  ;;  %v765_v10 = vld [vmem:[%s903_s24 + $0x28] sm:$0xff]  ;;  %p747_p5 = scmp.eq.s32.totalorder %s887_s16, 2 }
  0x1b   : > { %823 = vmatpush.bf16.msra.mxu2 %v767_v8  ;;  %361 = vmatpush.bf16.msra.mxu0 %v767_v8  ;;  %v764_v11 = vld [vmem:[%s903_s24 + $0x20] sm:$0xff]  ;;  %v763_v12 = vld [vmem:[%s903_s24 + $0x18] sm:$0xff]  ;;  %v762_v13 = vld [vmem:[%s903_s24 + $0x10] sm:$0xff] }
  0x1c   : > { %v761_v14 = vld [vmem:[%s903_s24 + $0x8] sm:$0xff]  ;;  %v760_v15 = vld [vmem:[%s903_s24] sm:$0xff]  ;;  %v754_v21 = vld [vmem:[#allocation2 + $0x10] sm:$0xff] }
  0x1d   : > { %v756_v16 = vld [vmem:[#allocation2 + $0x20] sm:$0xff]  ;;  %v753_v19 = vld [vmem:[#allocation2 + $0x8] sm:$0xff]  ;;  %v755_v23 = vld [vmem:[#allocation2 + $0x18] sm:$0xff] }
  0x1e   : > { %v752_v17 = vld [vmem:[#allocation2] sm:$0xff]  ;;  %v757_v18 = vld [vmem:[#allocation2 + $0x28] sm:$0xff]  ;;  %v770_v52 = vld [vmem:[%s1044_s0 + $0x10] sm:$0xff] }
  0x1f   : > { %824 = vmatpush.bf16.msra.mxu2 %v766_v9  ;;  %362 = vmatpush.bf16.msra.mxu0 %v766_v9  ;;  %v758_v20 = vld [vmem:[#allocation2 + $0x30] sm:$0xff]  ;;  %v768_v48 = vld [vmem:[%s1044_s0] sm:$0xff]  ;;  %v769_v50 = vld [vmem:[%s1044_s0 + $0x8] sm:$0xff] }
  0x20   : > { %v759_v22 = vld [vmem:[#allocation2 + $0x38] sm:$0xff]  ;;  %v772_v49 = vld [vmem:[%s1044_s0 + $0x20] sm:$0xff]  ;;  %v773_v51 = vld [vmem:[%s1044_s0 + $0x28] sm:$0xff] }
  0x21   : > { %v774_v53 = vld [vmem:[%s1044_s0 + $0x30] sm:$0xff]  ;;  %v771_v54 = vld [vmem:[%s1044_s0 + $0x18] sm:$0xff]  ;;  %v847_v56 = vld [vmem:[%s196_s21] ss:$0 sm:$0xff] }
  0x22   : > { %v775_v55 = vld [vmem:[%s1044_s0 + $0x38] sm:$0xff] }
  0x23   : > { %825 = vmatpush.bf16.msra.mxu2 %v765_v10  ;;  %363 = vmatpush.bf16.msra.mxu0 %v765_v10 }
  0x27   : > { %826 = vmatpush.bf16.msra.mxu2 %v764_v11  ;;  %364 = vmatpush.bf16.msra.mxu0 %v764_v11 }
  0x2b   : > { %827 = vmatpush.bf16.msra.mxu2 %v763_v12  ;;  %365 = vmatpush.bf16.msra.mxu0 %v763_v12 }
  0x2f   : > { %828 = vmatpush.bf16.msra.mxu2 %v762_v13  ;;  %366 = vmatpush.bf16.msra.mxu0 %v762_v13 }
  0x33   : > { %829 = vmatpush.bf16.msra.mxu2 %v761_v14  ;;  %367 = vmatpush.bf16.msra.mxu0 %v761_v14 }
  0x37   : > { %830 = vmatpush.bf16.msra.mxu2 %v760_v15  ;;  %368 = vmatpush.bf16.msra.mxu0 %v760_v15 }
  0x3a   : > { %389 = vmatmul.bf16.vlgmr.msra.gmra.mxu2 %v756_v16  ;;  %369 = vmatmul.bf16.vlgmr.msra.gmra.mxu0 %v752_v17 }
  0x4a   : > { %394 = vmatmul.bf16.gmra.mxu2 %v757_v18  ;;  %374 = vmatmul.bf16.gmra.mxu0 %v753_v19 }
  0x5a   : > { %399 = vmatmul.bf16.gmra.mxu2 %v758_v20  ;;  %379 = vmatmul.bf16.gmra.mxu0 %v754_v21 }
  0x6a   : > { %404 = vmatmul.bf16.gmra.mxu2 %v759_v22  ;;  %384 = vmatmul.bf16.gmra.mxu0 %v755_v23 }
  0xb7   : > { %v370_v25 = vpop.f32.mrf.mxu0 }
  0xbd   : > { %v390_v24 = vpop.f32.mrf.mxu2 }
  0xbf   : > { %v372_v27 = vpop.f32.mrf.mxu0 }
  0xc0   : > { %v426_v47 = vpack.c.bf16 %v372_v27, %v370_v25 }
  0xc5   : > { %v392_v26 = vpop.f32.mrf.mxu2 }
  0xc6   : > { %v430_v42 = vpack.c.bf16 %v392_v26, %v390_v24 }
  0xc7   : > { %v375_v29 = vpop.f32.mrf.mxu0 }
  0xcd   : > { %v395_v28 = vpop.f32.mrf.mxu2 }
  0xcf   : > { %v377_v31 = vpop.f32.mrf.mxu0 }
  0xd0   : > { %v427_v46 = vpack.c.bf16 %v377_v31, %v375_v29 }
  0xd5   : > { %v397_v30 = vpop.f32.mrf.mxu2 }
  0xd6   : > { %v431_v41 = vpack.c.bf16 %v397_v30, %v395_v28 }
  0xd7   : > { %v380_v33 = vpop.f32.mrf.mxu0 }
  0xdd   : > { %v400_v32 = vpop.f32.mrf.mxu2 }
  0xdf   : > { %v382_v36 = vpop.f32.mrf.mxu0 }
  0xe0   : > { %v428_v45 = vpack.c.bf16 %v382_v36, %v380_v33 }
  0xe5   : > { %v402_v34 = vpop.f32.mrf.mxu2 }
  0xe6   : > { %v432_v40 = vpack.c.bf16 %v402_v34, %v400_v32 }
  0xe7   : > { %v385_v39 = vpop.f32.mrf.mxu0 }
  0xed   : > { %v405_v35 = vpop.f32.mrf.mxu2 }
  0xef   : > { %v387_v43 = vpop.f32.mrf.mxu0 }
  0xf0   : > { %v429_v44 = vpack.c.bf16 %v387_v43, %v385_v39 }
  0xf5   : > { %v407_v37 = vpop.f32.mrf.mxu2 }
  0xf6   : > { %v433_v38 = vpack.c.bf16 %v407_v37, %v405_v35 }
  0xf8   : > { %486 = vmatpush.bf16.msra.mxu1 %v433_v38  ;;  %831 = vmatpush.bf16.msra.mxu3 %v433_v38 }
  0xfc   : > { %487 = vmatpush.bf16.msra.mxu1 %v432_v40  ;;  %832 = vmatpush.bf16.msra.mxu3 %v432_v40 }
 0x100   : > { %488 = vmatpush.bf16.msra.mxu1 %v431_v41  ;;  %833 = vmatpush.bf16.msra.mxu3 %v431_v41 }
 0x104   : > { %489 = vmatpush.bf16.msra.mxu1 %v430_v42  ;;  %834 = vmatpush.bf16.msra.mxu3 %v430_v42 }
 0x108   : > { %490 = vmatpush.bf16.msra.mxu1 %v429_v44  ;;  %835 = vmatpush.bf16.msra.mxu3 %v429_v44 }
 0x10c   : > { %491 = vmatpush.bf16.msra.mxu1 %v428_v45  ;;  %836 = vmatpush.bf16.msra.mxu3 %v428_v45 }
 0x110   : > { %492 = vmatpush.bf16.msra.mxu1 %v427_v46  ;;  %837 = vmatpush.bf16.msra.mxu3 %v427_v46 }
 0x114   : > { %493 = vmatpush.bf16.msra.mxu1 %v426_v47  ;;  %838 = vmatpush.bf16.msra.mxu3 %v426_v47 }
 0x117   : > { %494 = vmatmul.bf16.vlgmr.msra.gmra.mxu1 %v768_v48  ;;  %514 = vmatmul.bf16.vlgmr.msra.gmra.mxu3 %v772_v49 }
 0x127   : > { %499 = vmatmul.bf16.gmra.mxu1 %v769_v50  ;;  %519 = vmatmul.bf16.gmra.mxu3 %v773_v51 }
 0x137   : > { %504 = vmatmul.bf16.gmra.mxu1 %v770_v52  ;;  %524 = vmatmul.bf16.gmra.mxu3 %v774_v53 }
 0x147   : > { %509 = vmatmul.bf16.gmra.mxu1 %v771_v54  ;;  %529 = vmatmul.bf16.gmra.mxu3 %v775_v55 }
 0x194   : > { %v495_v57 = vpop.f32.mrf.mxu1 }
 0x195   : > { %v967_v58 = vadd.f32 %v847_v56, %v495_v57 }
 0x19a   : > { %v515_v59 = vpop.f32.mrf.mxu3 }
 0x19b   : > { %v969_v60 = vadd.f32 %v847_v56, %v515_v59 }
 0x19c   : > { %v497_v61 = vpop.f32.mrf.mxu1 }
 0x19d   : > { %v971_v62 = vadd.f32 %v847_v56, %v497_v61 }
 0x1a2   : > { %v517_v63 = vpop.f32.mrf.mxu3 }
 0x1a3   : > { %v973_v0 = vadd.f32 %v847_v56, %v517_v63 }
 0x1a4   : > { %v500_v1 = vpop.f32.mrf.mxu1 }
 0x1a5   : > { %v501_v2 = vadd.f32 %v847_v56, %v500_v1 }
 0x1aa   : > { %v520_v3 = vpop.f32.mrf.mxu3 }
 0x1ab   : > { %v975_v4 = vadd.f32 %v847_v56, %v520_v3 }
 0x1ac   : > { %v502_v5 = vpop.f32.mrf.mxu1 }
 0x1ad   : > { %v503_v6 = vadd.f32 %v847_v56, %v502_v5 }
 0x1b2   : > { %v522_v7 = vpop.f32.mrf.mxu3 }
 0x1b3   : > { %v977_v8 = vadd.f32 %v847_v56, %v522_v7 }
 0x1b4   : > { %v505_v9 = vpop.f32.mrf.mxu1 }
 0x1b5   : > { %v506_v10 = vadd.f32 %v847_v56, %v505_v9 }
 0x1ba   : > { %v525_v11 = vpop.f32.mrf.mxu3 }
 0x1bb   : > { %v526_v12 = vadd.f32 %v847_v56, %v525_v11 }
 0x1bc   : > { %v507_v13 = vpop.f32.mrf.mxu1 }
 0x1bd   : > { %v508_v14 = vadd.f32 %v847_v56, %v507_v13 }
 0x1c2   : > { %v527_v15 = vpop.f32.mrf.mxu3 }
 0x1c3   : > { %v528_v16 = vadd.f32 %v847_v56, %v527_v15 }
 0x1c4   : > { %v510_v17 = vpop.f32.mrf.mxu1 }
 0x1c5   : > { %v511_v18 = vadd.f32 %v847_v56, %v510_v17 }
 0x1ca   : > { %v530_v19 = vpop.f32.mrf.mxu3 }
 0x1cb   : > { %v531_v20 = vadd.f32 %v847_v56, %v530_v19 }
 0x1cc   : > { %v512_v21 = vpop.f32.mrf.mxu1 }
 0x1cd   : > { %v513_v22 = vadd.f32 %v847_v56, %v512_v21 }
 0x1cf   : > { %538 = sbr.rel (%p747_p5) target bundleno = 480 (0x1e0), region = 44 }
 0x1d2   : > { %v532_v23 = vpop.f32.mrf.mxu3 }
 0x1d3   : > { %v533_v24 = vadd.f32 %v847_v56, %v532_v23 }
 0x1d4   : > { %v539_v25 = vmax.f32 %v967_v58, 0.0  ;;  %v540_v26 = vmax.f32 %v971_v62, 0.0  ;;  %v541_v27 = vmax.f32 %v501_v2, 0.0  ;;  %v542_v28 = vmax.f32 %v503_v6, 0.0 }
 0x1d5   : > { %v543_v29 = vmax.f32 %v506_v10, 0.0  ;;  %v544_v30 = vmax.f32 %v508_v14, 0.0  ;;  %v545_v31 = vmax.f32 %v511_v18, 0.0  ;;  %v546_v32 = vmax.f32 %v513_v22, 0.0 }
 0x1d6   : > { %v779_v33 = vpack.c.bf16 %v540_v26, %v539_v25  ;;  %v784_v34 = vpack.c.bf16 %v542_v28, %v541_v27  ;;  %v547_v35 = vmax.f32 %v969_v60, 0.0  ;;  %v548_v36 = vmax.f32 %v973_v0, 0.0 }
 0x1d7   : > { %v789_v37 = vpack.c.bf16 %v544_v30, %v543_v29  ;;  %v794_v38 = vpack.c.bf16 %v546_v32, %v545_v31  ;;  %v549_v39 = vmax.f32 %v975_v4, 0.0  ;;  %v550_v40 = vmax.f32 %v977_v8, 0.0 }
 0x1d8   : > { %780 = vst [vmem:[#allocation2] sm:$0xff] %v779_v33   ;;  %v799_v41 = vpack.c.bf16 %v548_v36, %v547_v35  ;;  %v551_v42 = vmax.f32 %v526_v12, 0.0  ;;  %v552_v43 = vmax.f32 %v528_v16, 0.0  ;;  %v553_v44 = vmax.f32 %v531_v20, 0.0 }
 0x1d9   : > { %816 = vst [vmem:[#allocation2 + $0x8] sm:$0xff] %v784_v34   ;;  %v804_v45 = vpack.c.bf16 %v550_v40, %v549_v39  ;;  %v554_v46 = vmax.f32 %v533_v24, 0.0 }
 0x1da   : > { %817 = vst [vmem:[#allocation2 + $0x10] sm:$0xff] %v789_v37   ;;  %v809_v47 = vpack.c.bf16 %v552_v43, %v551_v42 }
 0x1db   : > { %818 = vst [vmem:[#allocation2 + $0x18] sm:$0xff] %v794_v38   ;;  %v814_v48 = vpack.c.bf16 %v554_v46, %v553_v44 }
 0x1dc   : > { %819 = vst [vmem:[#allocation2 + $0x20] sm:$0xff] %v799_v41  }
 0x1dd   : > { %820 = vst [vmem:[#allocation2 + $0x28] sm:$0xff] %v804_v45  }
 0x1de   : > { %821 = vst [vmem:[#allocation2 + $0x30] sm:$0xff] %v809_v47  }
 0x1df   : > { %822 = vst [vmem:[#allocation2 + $0x38] sm:$0xff] %v814_v48  }
 0x1e0 PF: > { %p748_p6 = scmp.ne.s32.totalorder %s887_s16, 2 }
 0x1e2   : > { %590 = sbr.rel (%p748_p6) target bundleno = 503 (0x1f7), region = 48 }
 0x1e7   : > { %591 = vst [vmem:[%s1048_s4] sm:$0xff] %v967_v58 }
 0x1e8   : > { %592 = vst [vmem:[%s1048_s4 + $0x8] sm:$0xff] %v971_v62 }
 0x1e9   : > { %593 = vst [vmem:[%s1048_s4 + $0x10] sm:$0xff] %v501_v2 }
 0x1ea   : > { %594 = vst [vmem:[%s1048_s4 + $0x18] sm:$0xff] %v503_v6 }
 0x1eb   : > { %595 = vst [vmem:[%s1048_s4 + $0x20] sm:$0xff] %v506_v10 }
 0x1ec   : > { %596 = vst [vmem:[%s1048_s4 + $0x28] sm:$0xff] %v508_v14 }
 0x1ed   : > { %597 = vst [vmem:[%s1048_s4 + $0x30] sm:$0xff] %v511_v18 }
 0x1ee   : > { %598 = vst [vmem:[%s1048_s4 + $0x38] sm:$0xff] %v513_v22 }
 0x1ef   : > { %599 = vst [vmem:[%s1048_s4 + $0x40] sm:$0xff] %v969_v60 }
 0x1f0   : > { %600 = vst [vmem:[%s1048_s4 + $0x48] sm:$0xff] %v973_v0 }
 0x1f1   : > { %601 = vst [vmem:[%s1048_s4 + $0x50] sm:$0xff] %v975_v4 }
 0x1f2   : > { %602 = vst [vmem:[%s1048_s4 + $0x58] sm:$0xff] %v977_v8 }
 0x1f3   : > { %603 = vst [vmem:[%s1048_s4 + $0x60] sm:$0xff] %v526_v12 }
 0x1f4   : > { %604 = vst [vmem:[%s1048_s4 + $0x68] sm:$0xff] %v528_v16 }
 0x1f5   : > { %605 = vst [vmem:[%s1048_s4 + $0x70] sm:$0xff] %v531_v20 }
 0x1f6   : > { %606 = vst [vmem:[%s1048_s4 + $0x78] sm:$0xff] %v533_v24 }
 0x1f7 PF: > { %s14_s15 = sadd.s32 1, %s854_s15  }
 0x1f8   : > { %p11_p7 = scmp.ge.s32.totalorder %s14_s15, 5  }
 0x1fa   :  { %13 = sbr.rel (!%p11_p7) target bundleno = 1 (0x1), region = 77 }

</bundles_post_ra>
